<compile_context>
chip_gen: v7x
topology: tpu7x:2x2x1
jax: 0.10.0
libtpu: 0.0.40
codegen_flags: <defaults>
</compile_context>

<pallas_src>
import functools

import jax
import jax.numpy as jnp
from jax import lax
from jax.experimental import pallas as pl
from jax.experimental.pallas import tpu as pltpu

EPS = 1e-5


def basic_block_kernel(x_ref, b1_ref, b2_ref, a_ref,
                       g1_ref, be1_ref, g2_ref, be2_ref, o_ref, *, h2):
    """Whole-block kernel on row-folded, channel-folded slabs.

    Shapes (NH2 = N*H/R slab rows, WC2 = R*W*C lanes, R = rows folded per slab row):
      x_ref    : (NH2, WC2)      f32   input slab (also reused for the shortcut)
      b1_ref   : (WC2, 3*WC2)    bf16  conv1: [B_same | B_up | B_down] fused
      b2_ref   : (WC2, 3*WC2)    bf16  conv2: same layout
      a_ref    : (WC2, WC2)      f32   per-channel averaging matrix / (N*H*W)
      g*/be*   : (1, WC2)        f32   BN gamma/beta pre-tiled to lane layout
      o_ref    : (NH2, WC2)      f32   output slab
      h2       : slab rows per image (H / R), static
    """
    NH2, WC2 = x_ref.shape
    x32 = x_ref[...]                      # residual reuses the resident tile
    a = a_ref[...]

    # Image-boundary masks for the cross-slab-row taps (hoisted, VPU filler).
    row = lax.broadcasted_iota(jnp.int32, (NH2, WC2), 0) % h2
    mtop = row != 0                       # rows whose "up" tap stays in-image
    mbot = row != (h2 - 1)                # rows whose "down" tap stays in-image

    def conv3x3(x_bf16, b_ref):
        # Single fused MXU launch: output is [same | up | down], each WC2 wide
        # (128-aligned slices -> no copies).  kw/channel contraction and the
        # W-boundary zero padding are baked into the banded weight blocks.
        t = jnp.dot(x_bf16, b_ref[...], preferred_element_type=jnp.float32)
        t_same = t[:, :WC2]
        t_up = t[:, WC2:2 * WC2]
        t_dn = t[:, 2 * WC2:]
        # Cross-slab-row taps: sublane roll (XLU) + boundary select (VPU).
        up = jnp.where(mtop, pltpu.roll(t_up, shift=1, axis=0), 0.0)        # out[r] += t_up[r-1]
        dn = jnp.where(mbot, pltpu.roll(t_dn, shift=NH2 - 1, axis=0), 0.0)  # out[r] += t_dn[r+1]
        return t_same + up + dn

    def bn_train(y, gamma_l, beta_l):
        # Training-mode BN, centered two-pass statistics.
        # Row-sum first (XLU sublane reduce), THEN the tiny (1,WC2)x(WC2,WC2)
        # matmul that both averages over spatial lanes of each channel and
        # re-expands the per-channel stat back to lane layout.
        mean_l = jnp.dot(jnp.sum(y, axis=0, keepdims=True), a,
                         preferred_element_type=jnp.float32)      # (1, WC2)
        d = y - mean_l
        var_l = jnp.dot(jnp.sum(d * d, axis=0, keepdims=True), a,
                        preferred_element_type=jnp.float32)       # biased var
        scale_l = gamma_l * lax.rsqrt(var_l + EPS)
        return d * scale_l + beta_l                                # fused pass

    # conv1 -> bn1 -> relu   (bf16 MXU operands, f32 accumulation / BN math)
    y = conv3x3(x32.astype(jnp.bfloat16), b1_ref)
    y = jnp.maximum(bn_train(y, g1_ref[...], be1_ref[...]), 0.0)

    # conv2 -> bn2
    y = conv3x3(y.astype(jnp.bfloat16), b2_ref)
    y = bn_train(y, g2_ref[...], be2_ref[...])

    # identity shortcut (stride == 1, in_planes == planes), then relu
    o_ref[...] = jnp.maximum(y + x32, 0.0).astype(o_ref.dtype)


def _fused_banded_weights(w_hwio, W, C, R):
    """Fold a (3,3,C,C) HWIO conv weight into one (R*W*C, 3*R*W*C) matrix.

    Lane index l = hpar*W*C + w*C + c, hpar in [0, R).  For input-slab-row
    offset d relative to the output slab row, the kh tap used is
    kh = R*d + hpar_in - hpar_out + 1;  kw = w_in - w_out + 1.  Entries outside
    kh,kw in [0,2] are zero, which bakes the W-boundary (and intra-slab-row
    H-boundary) zero padding into the band.  Blocks are concatenated along the
    output dim as [same (d=0) | up (d=-1) | down (d=+1)].
    """
    WC2 = R * W * C
    lin = jnp.arange(WC2)
    hpar = lin // (W * C)
    wpos = (lin % (W * C)) // C
    ch = lin % C

    kw = wpos[:, None] - wpos[None, :] + 1
    kw_valid = (kw >= 0) & (kw <= 2)
    kw_c = jnp.clip(kw, 0, 2)

    def block(d):
        kh = R * d + hpar[:, None] - hpar[None, :] + 1
        valid = kw_valid & (kh >= 0) & (kh <= 2)
        kh_c = jnp.clip(kh, 0, 2)
        vals = w_hwio[kh_c, kw_c, ch[:, None], ch[None, :]]       # (WC2, WC2)
        return jnp.where(valid, vals, 0.0)

    return jnp.concatenate([block(0), block(-1), block(1)], axis=1)  # (WC2, 3*WC2)


def basic_block(x_nhwc, w1, g1, b1, w2, g2, b2):
    N, H, W, C = x_nhwc.shape
    assert w1.shape[-1] == C and w2.shape[-1] == C, \
        "identity-shortcut config requires in_planes == planes"

    # Fold image rows into the lane axis until lanes >= 128 (full vregs,
    # unmasked output stores, better MXU contraction occupancy).
    R = 1
    while W * C * R < 128 and H % (2 * R) == 0:
        R *= 2
    H2 = H // R
    NH2, WC2 = N * H2, R * W * C

    # Layout plumbing (free reshape): (N,H,W,C) -> (N*H/R, R*W*C).
    x_rows = x_nhwc.reshape(NH2, WC2)

    # Conv weights -> fused banded lane-space matrices, bf16 for the MXU.
    b1m = _fused_banded_weights(w1, W, C, R).astype(jnp.bfloat16)
    b2m = _fused_banded_weights(w2, W, C, R).astype(jnp.bfloat16)

    # Per-channel averaging matrix (reduce over spatial lanes + re-expand).
    ch = jnp.arange(WC2) % C
    a_norm = (ch[:, None] == ch[None, :]).astype(jnp.float32) / float(N * H * W)

    # BN affine params pre-tiled to lane layout (broadcast hoisted to wrapper).
    g1l = jnp.tile(g1, R * W).reshape(1, WC2)
    b1l = jnp.tile(b1, R * W).reshape(1, WC2)
    g2l = jnp.tile(g2, R * W).reshape(1, WC2)
    b2l = jnp.tile(b2, R * W).reshape(1, WC2)

    vspec = pl.BlockSpec(memory_space=pltpu.MemorySpace.VMEM)

    # TODO(synk): at real ResNet-stage shapes, add an NH grid axis marked
    #             "parallel" (v7x second TensorCore) with a two-pass /
    #             cross-tile reduction for the training-mode BN statistics,
    #             and budget double-buffered tiles against 64 MiB VMEM.
    #             At this toy size the whole working set is < 1 MiB, so one
    #             ungridded invocation is simplest and fastest.
    out_rows = pl.pallas_call(
        functools.partial(basic_block_kernel, h2=H2),
        out_shape=jax.ShapeDtypeStruct((NH2, WC2), jnp.float32),
        in_specs=[vspec] * 8,
        out_specs=vspec,
    )(x_rows, b1m, b2m, a_norm, g1l, b1l, g2l, b2l)

    return out_rows.reshape(N, H, W, C)


def reference(x_nhwc, w1, g1, b1, w2, g2, b2):
    """Pure-JAX reference mirroring the PyTorch forward (training-mode BN)."""
    def conv(x, w):
        return lax.conv_general_dilated(
            x, w, window_strides=(1, 1), padding="SAME",
            dimension_numbers=("NHWC", "HWIO", "NHWC"))

    def bn(x, g, b):
        m = jnp.mean(x, axis=(0, 1, 2), keepdims=True)
        v = jnp.mean((x - m) ** 2, axis=(0, 1, 2), keepdims=True)
        return (x - m) / jnp.sqrt(v + EPS) * g.reshape(1, 1, 1, -1) + b.reshape(1, 1, 1, -1)

    o = jax.nn.relu(bn(conv(x_nhwc, w1), g1, b1))
    o = bn(conv(o, w2), g2, b2) + x_nhwc
    return jax.nn.relu(o)


if __name__ == "__main__":
    key = jax.random.PRNGKey(0)
    kx, k1, k2, kg1, kb1, kg2, kb2 = jax.random.split(key, 7)

    N, C, H, W = 2, 4, 16, 16          # in_planes = planes = 4, stride = 1
    x_nchw = jax.random.normal(kx, (N, C, H, W), jnp.float32)
    x_nhwc = jnp.transpose(x_nchw, (0, 2, 3, 1))   # NCHW -> NHWC

    # Conv weights in HWIO; BN affine params per channel (deterministic init).
    w1 = jax.random.normal(k1, (3, 3, C, C), jnp.float32) * 0.1
    w2 = jax.random.normal(k2, (3, 3, C, C), jnp.float32) * 0.1
    g1 = 1.0 + 0.1 * jax.random.normal(kg1, (C,), jnp.float32)
    b1 = 0.1 * jax.random.normal(kb1, (C,), jnp.float32)
    g2 = 1.0 + 0.1 * jax.random.normal(kg2, (C,), jnp.float32)
    b2 = 0.1 * jax.random.normal(kb2, (C,), jnp.float32)

    out = basic_block(x_nhwc, w1, g1, b1, w2, g2, b2)
    out = jax.block_until_ready(out)

    ref = reference(x_nhwc, w1, g1, b1, w2, g2, b2)
    assert out.shape == (N, H, W, C)
    # Conv operands run in bf16 on the MXU (f32 accumulation / f32 BN math),
    # so the comparison against the pure-f32 reference intentionally uses a
    # correspondingly looser tolerance (~bf16 mantissa, well below 5e-2 here).
    assert jnp.allclose(out, ref, atol=5e-2, rtol=5e-2), "mismatch vs JAX reference"

    print("KERNEL_OK")
</pallas_src>

<mosaic_0001>
module attributes {stable_mosaic.version = 11 : i64} {
  func.func @basic_block_kernel(%arg0: memref<16x128xf32, #tpu.memory_space<vmem>>, %arg1: memref<128x384xbf16, #tpu.memory_space<vmem>>, %arg2: memref<128x384xbf16, #tpu.memory_space<vmem>>, %arg3: memref<128x128xf32, #tpu.memory_space<vmem>>, %arg4: memref<1x128xf32, #tpu.memory_space<vmem>>, %arg5: memref<1x128xf32, #tpu.memory_space<vmem>>, %arg6: memref<1x128xf32, #tpu.memory_space<vmem>>, %arg7: memref<1x128xf32, #tpu.memory_space<vmem>>, %arg8: memref<16x128xf32, #tpu.memory_space<vmem>>) attributes {dimension_semantics = [], scalar_prefetch = 0 : i64, scratch_operands = 0 : i64, tpu.core_type = #tpu.core_type<tc>} {
    %c0 = arith.constant 0 : index
    %c0_0 = arith.constant 0 : index
    %0 = vector.load %arg0[%c0, %c0_0] : memref<16x128xf32, #tpu.memory_space<vmem>>, vector<16x128xf32>
    %c0_1 = arith.constant 0 : index
    %c0_2 = arith.constant 0 : index
    %1 = vector.load %arg3[%c0_1, %c0_2] : memref<128x128xf32, #tpu.memory_space<vmem>>, vector<128x128xf32>
    %2 = tpu.iota {dimensions = array<i32: 0>} : vector<16x128xi32>
    %c8_i32 = arith.constant 8 : i32
    %c0_i32 = arith.constant 0 : i32
    %3 = arith.cmpi eq, %c8_i32, %c0_i32 : i32
    %c1_i32 = arith.constant 1 : i32
    %4 = arith.select %3, %c1_i32, %c8_i32 : i32
    %5 = vector.broadcast %4 : i32 to vector<16x128xi32>
    %6 = arith.remsi %2, %5 : vector<16x128xi32>
    %c0_i32_3 = arith.constant 0 : i32
    %7 = vector.broadcast %c0_i32_3 : i32 to vector<16x128xi32>
    %8 = arith.cmpi ne, %6, %7 : vector<16x128xi32>
    %c0_i32_4 = arith.constant 0 : i32
    %9 = vector.broadcast %c0_i32_4 : i32 to vector<16x128xi32>
    %10 = arith.cmpi slt, %6, %9 : vector<16x128xi32>
    %c0_i32_5 = arith.constant 0 : i32
    %11 = arith.cmpi slt, %4, %c0_i32_5 : i32
    %12 = vector.broadcast %11 : i1 to vector<16x128xi1>
    %13 = vector.broadcast %12 : vector<16x128xi1> to vector<16x128xi1>
    %14 = arith.xori %10, %13 : vector<16x128xi1>
    %15 = arith.andi %14, %8 : vector<16x128xi1>
    %16 = vector.broadcast %4 : i32 to vector<16x128xi32>
    %17 = arith.addi %6, %16 : vector<16x128xi32>
    %18 = arith.select %15, %17, %6 : vector<16x128xi1>, vector<16x128xi32>
    %c0_i32_6 = arith.constant 0 : i32
    %19 = vector.broadcast %c0_i32_6 : i32 to vector<16x128xi32>
    %20 = arith.cmpi ne, %18, %19 : vector<16x128xi32>
    %c7_i32 = arith.constant 7 : i32
    %21 = vector.broadcast %c7_i32 : i32 to vector<16x128xi32>
    %22 = arith.cmpi ne, %18, %21 : vector<16x128xi32>
    %23 = arith.truncf %0 : vector<16x128xf32> to vector<16x128xbf16>
    %c0_7 = arith.constant 0 : index
    %c0_8 = arith.constant 0 : index
    %24 = vector.load %arg1[%c0_7, %c0_8] : memref<128x384xbf16, #tpu.memory_space<vmem>>, vector<128x384xbf16>
    %cst = arith.constant dense<0.000000e+00> : vector<16x384xf32>
    %25 = tpu.matmul %23, %24, %cst {dimension_numbers = #tpu.dot_dimension_numbers<[1], [0], [0], [1], [0, 0, 1, 1], [], []>} : vector<16x128xbf16>, vector<128x384xbf16>, vector<16x384xf32> -> vector<16x384xf32>
    %26 = vector.extract_strided_slice %25 {offsets = [0, 0], sizes = [16, 128], strides = [1, 1]} : vector<16x384xf32> to vector<16x128xf32>
    %27 = vector.extract_strided_slice %25 {offsets = [0, 128], sizes = [16, 128], strides = [1, 1]} : vector<16x384xf32> to vector<16x128xf32>
    %28 = vector.extract_strided_slice %25 {offsets = [0, 256], sizes = [16, 128], strides = [1, 1]} : vector<16x384xf32> to vector<16x128xf32>
    %c1_i32_9 = arith.constant 1 : i32
    %29 = tpu.dynamic_rotate %27 by %c1_i32_9 dim 0 : vector<16x128xf32>, i32 -> vector<16x128xf32>
    %cst_10 = arith.constant 0.000000e+00 : f32
    %30 = vector.broadcast %cst_10 : f32 to vector<16x128xf32>
    %31 = arith.select %20, %29, %30 : vector<16x128xi1>, vector<16x128xf32>
    %c15_i32 = arith.constant 15 : i32
    %32 = tpu.dynamic_rotate %28 by %c15_i32 dim 0 : vector<16x128xf32>, i32 -> vector<16x128xf32>
    %cst_11 = arith.constant 0.000000e+00 : f32
    %33 = vector.broadcast %cst_11 : f32 to vector<16x128xf32>
    %34 = arith.select %22, %32, %33 : vector<16x128xi1>, vector<16x128xf32>
    %35 = arith.addf %26, %31 : vector<16x128xf32>
    %36 = arith.addf %35, %34 : vector<16x128xf32>
    %c0_12 = arith.constant 0 : index
    %c0_13 = arith.constant 0 : index
    %37 = vector.load %arg4[%c0_12, %c0_13] : memref<1x128xf32, #tpu.memory_space<vmem>>, vector<1x128xf32>
    %c0_14 = arith.constant 0 : index
    %c0_15 = arith.constant 0 : index
    %38 = vector.load %arg5[%c0_14, %c0_15] : memref<1x128xf32, #tpu.memory_space<vmem>>, vector<1x128xf32>
    %cst_16 = arith.constant dense<0.000000e+00> : vector<128xf32>
    %39 = vector.multi_reduction <add>, %36, %cst_16 [0] : vector<16x128xf32> to vector<128xf32>
    %40 = vector.shape_cast %39 : vector<128xf32> to vector<1x128xf32>
    %cst_17 = arith.constant dense<0.000000e+00> : vector<1x128xf32>
    %41 = tpu.matmul %40, %1, %cst_17 {dimension_numbers = #tpu.dot_dimension_numbers<[1], [0], [0], [1], [0, 0, 1, 1], [], []>} : vector<1x128xf32>, vector<128x128xf32>, vector<1x128xf32> -> vector<1x128xf32>
    %42 = vector.broadcast %41 : vector<1x128xf32> to vector<16x128xf32>
    %43 = arith.subf %36, %42 : vector<16x128xf32>
    %44 = arith.mulf %43, %43 : vector<16x128xf32>
    %cst_18 = arith.constant dense<0.000000e+00> : vector<128xf32>
    %45 = vector.multi_reduction <add>, %44, %cst_18 [0] : vector<16x128xf32> to vector<128xf32>
    %46 = vector.shape_cast %45 : vector<128xf32> to vector<1x128xf32>
    %cst_19 = arith.constant dense<0.000000e+00> : vector<1x128xf32>
    %47 = tpu.matmul %46, %1, %cst_19 {dimension_numbers = #tpu.dot_dimension_numbers<[1], [0], [0], [1], [0, 0, 1, 1], [], []>} : vector<1x128xf32>, vector<128x128xf32>, vector<1x128xf32> -> vector<1x128xf32>
    %cst_20 = arith.constant 9.99999974E-6 : f32
    %48 = vector.broadcast %cst_20 : f32 to vector<1x128xf32>
    %49 = arith.addf %47, %48 : vector<1x128xf32>
    %50 = math.rsqrt %49 : vector<1x128xf32>
    %51 = arith.mulf %37, %50 : vector<1x128xf32>
    %52 = vector.broadcast %51 : vector<1x128xf32> to vector<16x128xf32>
    %53 = arith.mulf %43, %52 : vector<16x128xf32>
    %54 = vector.broadcast %38 : vector<1x128xf32> to vector<16x128xf32>
    %55 = arith.addf %53, %54 : vector<16x128xf32>
    %cst_21 = arith.constant 0.000000e+00 : f32
    %56 = vector.broadcast %cst_21 : f32 to vector<16x128xf32>
    %57 = arith.maximumf %55, %56 : vector<16x128xf32>
    %58 = arith.truncf %57 : vector<16x128xf32> to vector<16x128xbf16>
    %c0_22 = arith.constant 0 : index
    %c0_23 = arith.constant 0 : index
    %59 = vector.load %arg2[%c0_22, %c0_23] : memref<128x384xbf16, #tpu.memory_space<vmem>>, vector<128x384xbf16>
    %cst_24 = arith.constant dense<0.000000e+00> : vector<16x384xf32>
    %60 = tpu.matmul %58, %59, %cst_24 {dimension_numbers = #tpu.dot_dimension_numbers<[1], [0], [0], [1], [0, 0, 1, 1], [], []>} : vector<16x128xbf16>, vector<128x384xbf16>, vector<16x384xf32> -> vector<16x384xf32>
    %61 = vector.extract_strided_slice %60 {offsets = [0, 0], sizes = [16, 128], strides = [1, 1]} : vector<16x384xf32> to vector<16x128xf32>
    %62 = vector.extract_strided_slice %60 {offsets = [0, 128], sizes = [16, 128], strides = [1, 1]} : vector<16x384xf32> to vector<16x128xf32>
    %63 = vector.extract_strided_slice %60 {offsets = [0, 256], sizes = [16, 128], strides = [1, 1]} : vector<16x384xf32> to vector<16x128xf32>
    %c1_i32_25 = arith.constant 1 : i32
    %64 = tpu.dynamic_rotate %62 by %c1_i32_25 dim 0 : vector<16x128xf32>, i32 -> vector<16x128xf32>
    %cst_26 = arith.constant 0.000000e+00 : f32
    %65 = vector.broadcast %cst_26 : f32 to vector<16x128xf32>
    %66 = arith.select %20, %64, %65 : vector<16x128xi1>, vector<16x128xf32>
    %c15_i32_27 = arith.constant 15 : i32
    %67 = tpu.dynamic_rotate %63 by %c15_i32_27 dim 0 : vector<16x128xf32>, i32 -> vector<16x128xf32>
    %cst_28 = arith.constant 0.000000e+00 : f32
    %68 = vector.broadcast %cst_28 : f32 to vector<16x128xf32>
    %69 = arith.select %22, %67, %68 : vector<16x128xi1>, vector<16x128xf32>
    %70 = arith.addf %61, %66 : vector<16x128xf32>
    %71 = arith.addf %70, %69 : vector<16x128xf32>
    %c0_29 = arith.constant 0 : index
    %c0_30 = arith.constant 0 : index
    %72 = vector.load %arg6[%c0_29, %c0_30] : memref<1x128xf32, #tpu.memory_space<vmem>>, vector<1x128xf32>
    %c0_31 = arith.constant 0 : index
    %c0_32 = arith.constant 0 : index
    %73 = vector.load %arg7[%c0_31, %c0_32] : memref<1x128xf32, #tpu.memory_space<vmem>>, vector<1x128xf32>
    %cst_33 = arith.constant dense<0.000000e+00> : vector<128xf32>
    %74 = vector.multi_reduction <add>, %71, %cst_33 [0] : vector<16x128xf32> to vector<128xf32>
    %75 = vector.shape_cast %74 : vector<128xf32> to vector<1x128xf32>
    %cst_34 = arith.constant dense<0.000000e+00> : vector<1x128xf32>
    %76 = tpu.matmul %75, %1, %cst_34 {dimension_numbers = #tpu.dot_dimension_numbers<[1], [0], [0], [1], [0, 0, 1, 1], [], []>} : vector<1x128xf32>, vector<128x128xf32>, vector<1x128xf32> -> vector<1x128xf32>
    %77 = vector.broadcast %76 : vector<1x128xf32> to vector<16x128xf32>
    %78 = arith.subf %71, %77 : vector<16x128xf32>
    %79 = arith.mulf %78, %78 : vector<16x128xf32>
    %cst_35 = arith.constant dense<0.000000e+00> : vector<128xf32>
    %80 = vector.multi_reduction <add>, %79, %cst_35 [0] : vector<16x128xf32> to vector<128xf32>
    %81 = vector.shape_cast %80 : vector<128xf32> to vector<1x128xf32>
    %cst_36 = arith.constant dense<0.000000e+00> : vector<1x128xf32>
    %82 = tpu.matmul %81, %1, %cst_36 {dimension_numbers = #tpu.dot_dimension_numbers<[1], [0], [0], [1], [0, 0, 1, 1], [], []>} : vector<1x128xf32>, vector<128x128xf32>, vector<1x128xf32> -> vector<1x128xf32>
    %cst_37 = arith.constant 9.99999974E-6 : f32
    %83 = vector.broadcast %cst_37 : f32 to vector<1x128xf32>
    %84 = arith.addf %82, %83 : vector<1x128xf32>
    %85 = math.rsqrt %84 : vector<1x128xf32>
    %86 = arith.mulf %72, %85 : vector<1x128xf32>
    %87 = vector.broadcast %86 : vector<1x128xf32> to vector<16x128xf32>
    %88 = arith.mulf %78, %87 : vector<16x128xf32>
    %89 = vector.broadcast %73 : vector<1x128xf32> to vector<16x128xf32>
    %90 = arith.addf %88, %89 : vector<16x128xf32>
    %91 = arith.addf %90, %0 : vector<16x128xf32>
    %cst_38 = arith.constant 0.000000e+00 : f32
    %92 = vector.broadcast %cst_38 : f32 to vector<16x128xf32>
    %93 = arith.maximumf %91, %92 : vector<16x128xf32>
    %c0_39 = arith.constant 0 : index
    %c0_40 = arith.constant 0 : index
    %94 = vector.load %arg8[%c0_39, %c0_40] : memref<16x128xf32, #tpu.memory_space<vmem>>, vector<16x128xf32>
    tpu.vector_store %arg8[%c0_39, %c0_40], %93 {strides = array<i32>} : memref<16x128xf32, #tpu.memory_space<vmem>>, vector<16x128xf32>,
    return
  }
}

</mosaic_0001>

<bundles_post_ra>
// kernel: tpu_custom_call.1
= control target key start
LH: loop header
LB: loop body
LE: loop exit
PB: predicated region body
PF: predicated region fallthrough
CT: control target
= control target key end

     0   :  { %13 = vsyncpa [#allocation3], 0  ;;  %s2002_s0 = inlined_call_operand.hbm [shape: f32[16,128], index: 0, kind: input, shape index: {}]   ;;  %s2003_s1 = inlined_call_operand.hbm [shape: bf16[128,384], index: 1, kind: input, shape index: {}]   ;;  %s2004_s2 = inlined_call_operand.hbm [shape: bf16[128,384], index: 2, kind: input, shape index: {}]   ;;  %s2005_s3 = inlined_call_operand.hbm [shape: f32[128,128], index: 3, kind: input, shape index: {}]   ;;  %s2006_s4 = inlined_call_operand.vmem [shape: f32[1,128], index: 4, kind: input, shape index: {}]   ;;  %s2007_s5 = inlined_call_operand.vmem [shape: f32[1,128], index: 5, kind: input, shape index: {}]   ;;  %s2008_s6 = inlined_call_operand.vmem [shape: f32[1,128], index: 6, kind: input, shape index: {}]   ;;  %s2009_s7 = inlined_call_operand.vmem [shape: f32[1,128], index: 7, kind: input, shape index: {}]   ;;  %s2010_s8 = inlined_call_operand.hbm [shape: f32[16,128], index: 8, kind: output, shape index: {}]  }
   0x1   :  { %14 = vsyncpa [#allocation6], 0 }
   0x2   :  { %15 = vsyncpa [#allocation9], 0 }
   0x3   :  { %16 = vsyncpa [#allocation4], 0  ;;  %s1661_s27 = smov [#allocation5]   ;;  %s1543_s9 = scalar_lea.hbm %s2003_s1, 3072 }
   0x4   :  { %s34_s28 = sshll.u32 %s1661_s27, 4  ;;  %p1544_p0 = scmp.ne.s32.totalorder %s2003_s1, %s1543_s9  ;;  %s35_s28 = int_to_ptr.vmem [resolvable:$true] %s34_s28 }
   0x5   :  { %p1547_p1 = scmp.lt.u32.totalorder %s1543_s9, %s2003_s1 }
   0x7   :  { %p1549_p2 = pnand %p1547_p1, %p1544_p0 }
   0x9   :  { %1552 = shalt.err (!%p1549_p2)
}
   0xa   :  { %s1553_s14 = scalar_lea.vmem %s35_s28, 3072  ;;  %p1558_p4 = scmp.lt.s32.totalorder %s35_s28, %s35_s28 }
   0xb   :  { %p1554_p3 = scmp.ne.s32.totalorder %s35_s28, %s1553_s14  ;;  %p1559_p5 = scmp.lt.s32.totalorder %s1553_s14, %s1553_s14 }
   0xd   :  { %p1560_p6 = por %p1559_p5, %p1558_p4 }
   0xf   :  { %p1561_p7 = pnand %p1560_p6, %p1554_p3 }
  0x11   :  { %1564 = shalt.err (!%p1561_p7)
}
  0x12   :  { %s1662_s15 = smov 192   ;;  %s1663_s16 = smov 12  }
  0x13   :  { %40 = dma.hbm_to_vmem [thread:$0]  %s2003_s1, 3072, %s35_s28, [#allocation6], %s1662_s15, %s1662_s15, %s1663_s16  }
  0x14   :  { %s1664_s19 = smov [#allocation2]   ;;  %s1565_s23 = scalar_lea.hbm %s2002_s0, 256 }
  0x15   :  { %s22_s20 = sshll.u32 %s1664_s19, 4  ;;  %p1566_p8 = scmp.ne.s32.totalorder %s2002_s0, %s1565_s23  ;;  %s23_s20 = int_to_ptr.vmem [resolvable:$true] %s22_s20 }
  0x16   :  { %p1569_p9 = scmp.lt.u32.totalorder %s1565_s23, %s2002_s0 }
  0x18   :  { %p1571_p10 = pnand %p1569_p9, %p1566_p8 }
  0x1a   :  { %1574 = shalt.err (!%p1571_p10)
}
  0x1b   :  { %s1575_s29 = scalar_lea.vmem %s23_s20, 256  ;;  %p1580_p12 = scmp.lt.s32.totalorder %s23_s20, %s23_s20 }
  0x1c   :  { %p1576_p11 = scmp.ne.s32.totalorder %s23_s20, %s1575_s29  ;;  %p1581_p13 = scmp.lt.s32.totalorder %s1575_s29, %s1575_s29 }
  0x1e   :  { %p1582_p0 = por %p1581_p13, %p1580_p12 }
  0x20   :  { %p1583_p1 = pnand %p1582_p0, %p1576_p11 }
  0x22   :  { %1586 = shalt.err (!%p1583_p1)
}
  0x23   :  { %s1665_s1 = smov 128   ;;  %s1666_s28 = smov 8  }
  0x24   :  { %28 = dma.hbm_to_vmem [thread:$0]  %s2002_s0, 256, %s23_s20, [#allocation3], %s1665_s1, %s1665_s1, %s1666_s28  }
  0x25   :  { %s1667_s10 = smov [#allocation7]   ;;  %s1668_s12 = smov [#allocation8]  }
  0x26   :  { %s46_s11 = sshll.u32 %s1667_s10, 4  ;;  %s58_s13 = sshll.u32 %s1668_s12, 4  ;;  %s47_s11 = int_to_ptr.vmem [resolvable:$true] %s46_s11  ;;  %s1749_s13 = int_to_ptr.vmem [resolvable:$true] %s58_s13 }
  0x27   :  { %s1587_s18 = scalar_lea.hbm %s2004_s2, 3072 }
  0x28   :  { %p1588_p2 = scmp.ne.s32.totalorder %s2004_s2, %s1587_s18  ;;  %p1591_p3 = scmp.lt.u32.totalorder %s1587_s18, %s2004_s2 }
  0x2a   :  { %p1593_p4 = pnand %p1591_p3, %p1588_p2 }
  0x2c   :  { %1596 = shalt.err (!%p1593_p4)
}
  0x2d   :  { %s1597_s0 = scalar_lea.vmem %s47_s11, 3072  ;;  %p1602_p6 = scmp.lt.s32.totalorder %s47_s11, %s47_s11 }
  0x2e   :  { %p1598_p5 = scmp.ne.s32.totalorder %s47_s11, %s1597_s0  ;;  %p1603_p7 = scmp.lt.s32.totalorder %s1597_s0, %s1597_s0 }
  0x30   :  { %p1604_p8 = por %p1603_p7, %p1602_p6 }
  0x32   :  { %p1605_p9 = pnand %p1604_p8, %p1598_p5 }
  0x34   :  { %1608 = shalt.err (!%p1605_p9)
}
  0x35   :  { %52 = dma.hbm_to_vmem [thread:$0]  %s2004_s2, 3072, %s47_s11, [#allocation6], %s1662_s15, %s1662_s15, %s1663_s16  }
  0x36   :  { %s1609_s27 = scalar_lea.hbm %s2005_s3, 2048 }
  0x37   :  { %p1610_p10 = scmp.ne.s32.totalorder %s2005_s3, %s1609_s27  ;;  %p1613_p11 = scmp.lt.u32.totalorder %s1609_s27, %s2005_s3 }
  0x39   :  { %p1615_p12 = pnand %p1613_p11, %p1610_p10 }
  0x3b   :  { %1618 = shalt.err (!%p1615_p12)
}
  0x3c   :  { %s1619_s12 = scalar_lea.vmem %s1749_s13, 2048  ;;  %p1624_p0 = scmp.lt.s32.totalorder %s1749_s13, %s1749_s13 }
  0x3d   :  { %p1620_p13 = scmp.ne.s32.totalorder %s1749_s13, %s1619_s12  ;;  %p1625_p1 = scmp.lt.s32.totalorder %s1619_s12, %s1619_s12 }
  0x3f   :  { %p1626_p2 = por %p1625_p1, %p1624_p0 }
  0x41   :  { %p1627_p3 = pnand %p1626_p2, %p1620_p13 }
  0x43   :  { %1630 = shalt.err (!%p1627_p3)
}
  0x44   :  { %64 = dma.hbm_to_vmem [thread:$0]  %s2005_s3, 2048, %s1749_s13, [#allocation9], %s1665_s1, %s1665_s1, %s1666_s28  }
  0x45   :  { %1653 = dma.done.wait [#allocation3], 256  }
  0x46   :  { %1654 = vsyncadd [#allocation3], 4294967040 }
  0x47   :  { %1655 = dma.done.wait [#allocation6], 6144  }
  0x48   :  { %1656 = vsyncadd [#allocation6], 4294961152 }
  0x49   :  { %1657 = dma.done.wait [#allocation9], 2048  }
  0x4a   :  { %1658 = vsyncadd [#allocation9], 4294965248  ;;  %v1669_v0 = vmov 0.0   ;;  %v1670_v1 = vmov 0   ;;  %vm1671_vm0 = vmmov 0   ;;  %v1796_v25 = vld [vmem:[#allocation2] sm:$0xff]  ;;  %v104_v54 = vlaneseq }
  0x4b   :  { %1186 = vmatprep.subr.bf16.mxu1 %v1669_v0  ;;  %328 = vmatprep.mubr.bf16.mxu0 %v1670_v1  ;;  %v1475_v2 = vld [vmem:[#allocation5 + $0x4] ss:$12 sps:$4 sm:$0xff]   ;;  %v1477_v3 = vld [vmem:[#allocation5] ss:$12 sps:$4 sm:$0xff]   ;;  %v1478_v4 = vld [vmem:[#allocation5 + $0x8] ss:$12 sps:$4 sm:$0xff]  }
  0x4c   :  { %1202 = vmatprep.mubr.msk.bf16.mxu1 %vm1671_vm0, %v1669_v0  ;;  %296 = vmatprep.subr.bf16.mxu0 %v1475_v2  ;;  %v1479_v5 = vld [vmem:[#allocation5 + $0x1c] ss:$12 sps:$4 sm:$0xff]   ;;  %v1481_v6 = vld [vmem:[#allocation5 + $0x18] ss:$12 sps:$4 sm:$0xff]   ;;  %v1482_v7 = vld [vmem:[#allocation5 + $0x20] ss:$12 sps:$4 sm:$0xff]  }
  0x4d   :  { %297 = vmatpush1.bf16.msra.mxu0 %v1477_v3  ;;  %1187 = vmatpush3.bf16.msra.mxu1 %v1478_v4  ;;  %v1483_v8 = vld [vmem:[#allocation5 + $0x34] ss:$12 sps:$4 sm:$0xff]   ;;  %v1485_v9 = vld [vmem:[#allocation5 + $0x30] ss:$12 sps:$4 sm:$0xff]   ;;  %v1486_v10 = vld [vmem:[#allocation5 + $0x38] ss:$12 sps:$4 sm:$0xff]  }
  0x4e   :  { %298 = vmatprep.subr.bf16.mxu0 %v1479_v5  ;;  %1188 = vmatprep.subr.bf16.mxu1 %v1669_v0  ;;  %v1487_v11 = vld [vmem:[#allocation5 + $0x4c] ss:$12 sps:$4 sm:$0xff]   ;;  %v1489_v12 = vld [vmem:[#allocation5 + $0x48] ss:$12 sps:$4 sm:$0xff]   ;;  %v1490_v13 = vld [vmem:[#allocation5 + $0x50] ss:$12 sps:$4 sm:$0xff]  }
  0x4f   :  { %v1491_v14 = vld [vmem:[#allocation5 + $0x64] ss:$12 sps:$4 sm:$0xff]   ;;  %v1493_v15 = vld [vmem:[#allocation5 + $0x60] ss:$12 sps:$4 sm:$0xff]   ;;  %v1494_v16 = vld [vmem:[#allocation5 + $0x68] ss:$12 sps:$4 sm:$0xff]  }
  0x50   :  { %v1495_v17 = vld [vmem:[#allocation5 + $0x7c] ss:$12 sps:$4 sm:$0xff]   ;;  %v1497_v18 = vld [vmem:[#allocation5 + $0x78] ss:$12 sps:$4 sm:$0xff]   ;;  %v1498_v19 = vld [vmem:[#allocation5 + $0x80] ss:$12 sps:$4 sm:$0xff]  }
  0x51   :  { %299 = vmatpush1.bf16.msra.mxu0 %v1481_v6  ;;  %1189 = vmatpush3.bf16.msra.mxu1 %v1482_v7  ;;  %v1499_v20 = vld [vmem:[#allocation5 + $0x94] ss:$12 sps:$4 sm:$0xff]   ;;  %v1501_v21 = vld [vmem:[#allocation5 + $0x90] ss:$12 sps:$4 sm:$0xff]   ;;  %v1502_v22 = vld [vmem:[#allocation5 + $0x98] ss:$12 sps:$4 sm:$0xff]  }
  0x52   :  { %300 = vmatprep.subr.bf16.mxu0 %v1483_v8  ;;  %1190 = vmatprep.subr.bf16.mxu1 %v1669_v0  ;;  %v1503_v23 = vld [vmem:[#allocation5 + $0xac] ss:$12 sps:$4 sm:$0xff]   ;;  %v1505_v24 = vld [vmem:[#allocation5 + $0xa8] ss:$12 sps:$4 sm:$0xff]   ;;  %v1506_v27 = vld [vmem:[#allocation5 + $0xb0] ss:$12 sps:$4 sm:$0xff]  }
  0x53   :  { %v1798_v26 = vld [vmem:[#allocation2 + $0x8] sm:$0xff]  ;;  %v88_v28 = vld [vmem:[#allocation8] sm:$0xff]  ;;  %v89_v29 = vld [vmem:[#allocation8 + $0x8] sm:$0xff]  ;;  %v1672_v32 = vmov 0.0|0.0   ;;  %v1856_v55 = vshrl.u32 %v104_v54, 7  ;;  %s1673_s18 = smov [#allocation10]  }
  0x54   :  { %v135_v30 = vpack.c.bf16 %v1798_v26, %v1796_v25  ;;  %v1803_v31 = vpack.c.bf16 %v89_v29, %v88_v28  ;;  %v90_v33 = vld [vmem:[#allocation8 + $0x10] sm:$0xff]  ;;  %v91_v34 = vld [vmem:[#allocation8 + $0x18] sm:$0xff]  ;;  %v92_v36 = vld [vmem:[#allocation8 + $0x20] sm:$0xff]  ;;  %s1036_s19 = sshll.u32 %s1673_s18, 4  ;;  %s1037_s19 = int_to_ptr.vmem [resolvable:$true] %s1036_s19 }
  0x55   :  { %301 = vmatpush1.bf16.msra.mxu0 %v1485_v9  ;;  %1191 = vmatpush3.bf16.msra.mxu1 %v1486_v10  ;;  %v1808_v35 = vpack.c.bf16 %v91_v34, %v90_v33  ;;  %v93_v37 = vld [vmem:[#allocation8 + $0x28] sm:$0xff]  ;;  %v94_v39 = vld [vmem:[#allocation8 + $0x30] sm:$0xff]  ;;  %v95_v40 = vld [vmem:[#allocation8 + $0x38] sm:$0xff]  ;;  %v106_v56 = vadd.s32 8, %v1856_v55  ;;  %v111_v57 = vand.u32 7, %v1856_v55  ;;  %vm389_vm1 = vcmp.lt.s32.totalorder %v1856_v55, 7  ;;  %p1636_p5 = scmp.lt.s32.totalorder %s1037_s19, %s1037_s19 }
  0x56   :  { %302 = vmatprep.subr.bf16.mxu0 %v1487_v11  ;;  %1192 = vmatprep.subr.bf16.mxu1 %v1669_v0  ;;  %v1821_v38 = vpack.c.bf16 %v93_v37, %v92_v36  ;;  %v1827_v41 = vpack.c.bf16 %v95_v40, %v94_v39  ;;  %v96_v42 = vld [vmem:[#allocation8 + $0x40] sm:$0xff]  ;;  %v97_v43 = vld [vmem:[#allocation8 + $0x48] sm:$0xff]  ;;  %v98_v45 = vld [vmem:[#allocation8 + $0x50] sm:$0xff]  ;;  %vm382_vm3 = vcmp.lt.s32.totalorder %v1856_v55, 1 }
  0x57   :  { %v1833_v44 = vpack.c.bf16 %v97_v43, %v96_v42  ;;  %v99_v46 = vld [vmem:[#allocation8 + $0x58] sm:$0xff]  ;;  %v100_v48 = vld [vmem:[#allocation8 + $0x60] sm:$0xff]  ;;  %v101_v49 = vld [vmem:[#allocation8 + $0x68] sm:$0xff]  ;;  %v118_v59 = vand.u32 7, %v106_v56  ;;  %vm1861_vm2 = vcmp.ne.s32.totalorder %v111_v57, 0  ;;  %vm1870_vm5 = vcmp.ne.s32.totalorder %v111_v57, 7 }
  0x58   :  { %v1839_v47 = vpack.c.bf16 %v99_v46, %v98_v45  ;;  %v1842_v50 = vpack.c.bf16 %v101_v49, %v100_v48  ;;  %v102_v51 = vld [vmem:[#allocation8 + $0x70] sm:$0xff]  ;;  %v103_v52 = vld [vmem:[#allocation8 + $0x78] sm:$0xff]  ;;  %v1507_v37 = vld [vmem:[#allocation7] ss:$12 sps:$4 sm:$0xff]   ;;  %v1896_v43 = vsub.s32 0, %v1856_v55 }
  0x59   :  { %303 = vmatpush1.bf16.msra.mxu0 %v1489_v12  ;;  %1193 = vmatpush3.bf16.msra.mxu1 %v1490_v13  ;;  %v1848_v53 = vpack.c.bf16 %v103_v52, %v102_v51  ;;  %vm1866_vm4 = vcmp.ne.s32.totalorder %v118_v59, 0  ;;  %vm1874_vm6 = vcmp.ne.s32.totalorder %v118_v59, 7  ;;  %v1509_v39 = vld [vmem:[#allocation7 + $0x4] ss:$12 sps:$4 sm:$0xff]   ;;  %v1513_v40 = vld [vmem:[#allocation7 + $0x1c] ss:$12 sps:$4 sm:$0xff]  }
  0x5a   :  { %304 = vmatprep.subr.bf16.mxu0 %v1491_v14  ;;  %1194 = vmatprep.subr.bf16.mxu1 %v1669_v0  ;;  %v1511_v42 = vld [vmem:[#allocation7 + $0x18] ss:$12 sps:$4 sm:$0xff]  }
  0x5d   :  { %305 = vmatpush1.bf16.msra.mxu0 %v1493_v15  ;;  %1195 = vmatpush3.bf16.msra.mxu1 %v1494_v16 }
  0x5e   :  { %306 = vmatprep.subr.bf16.mxu0 %v1495_v17  ;;  %1196 = vmatprep.subr.bf16.mxu1 %v1669_v0 }
  0x61   :  { %307 = vmatpush1.bf16.msra.mxu0 %v1497_v18  ;;  %1197 = vmatpush3.bf16.msra.mxu1 %v1498_v19 }
  0x62   :  { %308 = vmatprep.subr.bf16.mxu0 %v1499_v20  ;;  %1198 = vmatprep.subr.bf16.mxu1 %v1669_v0 }
  0x65   :  { %309 = vmatpush1.bf16.msra.mxu0 %v1501_v21  ;;  %1199 = vmatpush3.bf16.msra.mxu1 %v1502_v22 }
  0x66   :  { %310 = vmatprep.subr.bf16.mxu0 %v1503_v23  ;;  %1200 = vmatprep.subr.bf16.mxu1 %v1669_v0 }
  0x69   :  { %311 = vmatpush1.bf16.msra.mxu0 %v1505_v24  ;;  %1201 = vmatpush3.bf16.msra.mxu1 %v1506_v27 }
  0x6a   :  { %1366 = vmatprep.subr.bf16.mxu0 %v1672_v32  ;;  %1390 = vmatprep.subr.bf16.mxu1 %v1672_v32 }
  0x6c   :  { %329 = vmatmul.mubr.bf16.vlgmr.msra.gmra.mrb[0].mxu0 %v135_v30  ;;  %1203 = vmatmul.mubr.bf16.vlgmr.msra.gmra.mrb[0].mxu1 %v135_v30 }
  0x6d   :  { %1368 = vmatpush3.bf16.msra.mxu0 %v1803_v31  ;;  %1238 = vmatprep.mubr.msk.f32.mxu0 %vm1671_vm0, %v1669_v0 }
  0x6e   :  { %1369 = vmatprep.subr.bf16.mxu0 %v1672_v32  ;;  %1392 = vmatpush3.bf16.msra.mxu1 %v1803_v31 }
  0x6f   :  { %1273 = vmatprep.mubr.msk.f32.mxu1 %vm1671_vm0, %v1669_v0  ;;  %1393 = vmatprep.subr.bf16.mxu1 %v1672_v32 }
  0x71   :  { %1371 = vmatpush3.bf16.msra.mxu0 %v1808_v35 }
  0x72   :  { %1372 = vmatprep.subr.bf16.mxu0 %v1672_v32  ;;  %1395 = vmatpush3.bf16.msra.mxu1 %v1808_v35 }
  0x73   :  { %1396 = vmatprep.subr.bf16.mxu1 %v1672_v32 }
  0x75   :  { %1374 = vmatpush3.bf16.msra.mxu0 %v1821_v38 }
  0x76   :  { %1398 = vmatpush3.bf16.msra.mxu1 %v1821_v38  ;;  %1375 = vmatprep.subr.bf16.mxu0 %v1672_v32 }
  0x77   :  { %1399 = vmatprep.subr.bf16.mxu1 %v1672_v32 }
  0x79   :  { %1377 = vmatpush3.bf16.msra.mxu0 %v1827_v41 }
  0x7a   :  { %1401 = vmatpush3.bf16.msra.mxu1 %v1827_v41  ;;  %1378 = vmatprep.subr.bf16.mxu0 %v1672_v32 }
  0x7b   :  { %1402 = vmatprep.subr.bf16.mxu1 %v1672_v32 }
  0x7d   :  { %1380 = vmatpush3.bf16.msra.mxu0 %v1833_v44 }
  0x7e   :  { %1404 = vmatpush3.bf16.msra.mxu1 %v1833_v44  ;;  %1381 = vmatprep.subr.bf16.mxu0 %v1672_v32 }
  0x7f   :  { %1405 = vmatprep.subr.bf16.mxu1 %v1672_v32 }
  0x81   :  { %1383 = vmatpush3.bf16.msra.mxu0 %v1839_v47 }
  0x82   :  { %1407 = vmatpush3.bf16.msra.mxu1 %v1839_v47  ;;  %1384 = vmatprep.subr.bf16.mxu0 %v1672_v32 }
  0x83   :  { %1408 = vmatprep.subr.bf16.mxu1 %v1672_v32 }
  0x85   :  { %1386 = vmatpush3.bf16.msra.mxu0 %v1842_v50 }
  0x86   :  { %1410 = vmatpush3.bf16.msra.mxu1 %v1842_v50  ;;  %1387 = vmatprep.subr.bf16.mxu0 %v1672_v32 }
  0x87   :  { %1411 = vmatprep.subr.bf16.mxu1 %v1672_v32 }
  0x89   :  { %1389 = vmatpush3.bf16.msra.mxu0 %v1848_v53 }
  0x8a   :  { %1413 = vmatpush3.bf16.msra.mxu1 %v1848_v53  ;;  %743 = vmatprep.subr.bf16.mxu0 %v1509_v39 }
  0x8b   :  { %1276 = vmatprep.subr.bf16.mxu1 %v1669_v0 }
 0x13f   :  { %v330_v58 = vpop.f32.mrb[0].mxu0  ;;  %v373_v60 = vpop.f32.mrb[0].mxu1 }
 0x140   :  { %v332_v61 = vpop.f32.mrb[1].mxu0  ;;  %v387_v62 = vrot.slane %v373_v60, 1  ;;  %v1204_v63 = vpop.f32.mrb[1].mxu1 }
 0x141   :  { %v334_v2 = vpop.f32.mrb[2].mxu0  ;;  %v376_v3 = vpop.f32.mrb[2].mxu1  ;;  %v380_v6 = vrot.slane %v332_v61, 7  ;;  %v1510_v61 = vld [vmem:[#allocation7 + $0x8] ss:$12 sps:$4 sm:$0xff]  }
 0x142   :  { %v336_v5 = vpop.f32.mrb[3].mxu0  ;;  %v388_v7 = vrot.slane %v376_v3, 1  ;;  %v1205_v10 = vpop.f32.mrb[3].mxu1  ;;  %v1514_v63 = vld [vmem:[#allocation7 + $0x20] ss:$12 sps:$4 sm:$0xff]  }
 0x143   :  { %v381_v9 = vrot.slane %v336_v5, 7  ;;  %v1515_v3 = vld [vmem:[#allocation7 + $0x30] ss:$12 sps:$4 sm:$0xff]   ;;  %v1518_v5 = vld [vmem:[#allocation7 + $0x38] ss:$12 sps:$4 sm:$0xff]  }
 0x144   :  { %v390_v13 = vsel %vm389_vm1, %v387_v62, %v388_v7  ;;  %v391_v14 = vsel %vm389_vm1, %v388_v7, %v387_v62  ;;  %v1519_v7 = vld [vmem:[#allocation7 + $0x48] ss:$12 sps:$4 sm:$0xff]   ;;  %v1525_v10 = vld [vmem:[#allocation7 + $0x64] ss:$12 sps:$4 sm:$0xff]  }
 0x145   :  { %v383_v15 = vsel %vm382_vm3, %v380_v6, %v381_v9  ;;  %v384_v16 = vsel %vm382_vm3, %v381_v9, %v380_v6  ;;  %v392_v21 = vsel %vm1870_vm5, %v390_v13, 0.0  ;;  %v393_v22 = vsel %vm1874_vm6, %v391_v14, 0.0  ;;  %v1521_v6 = vld [vmem:[#allocation7 + $0x4c] ss:$12 sps:$4 sm:$0xff]   ;;  %v1522_v9 = vld [vmem:[#allocation7 + $0x50] ss:$12 sps:$4 sm:$0xff]  }
 0x146   :  { %v385_v17 = vsel %vm1861_vm2, %v384_v16, 0.0  ;;  %v386_v18 = vsel %vm1866_vm4, %v383_v15, 0.0  ;;  %v1523_v13 = vld [vmem:[#allocation7 + $0x60] ss:$12 sps:$4 sm:$0xff]   ;;  %v1526_v14 = vld [vmem:[#allocation7 + $0x68] ss:$12 sps:$4 sm:$0xff]  }
 0x147   :  { %v394_v19 = vadd.f32 %v385_v17, %v330_v58  ;;  %v395_v20 = vadd.f32 %v386_v18, %v334_v2  ;;  %v1517_v2 = vld [vmem:[#allocation7 + $0x34] ss:$12 sps:$4 sm:$0xff]   ;;  %v1529_v15 = vld [vmem:[#allocation7 + $0x7c] ss:$12 sps:$4 sm:$0xff]   ;;  %v1527_v16 = vld [vmem:[#allocation7 + $0x78] ss:$12 sps:$4 sm:$0xff]  }
 0x148   :  { %v1530_v17 = vld [vmem:[#allocation7 + $0x80] ss:$12 sps:$4 sm:$0xff]  }
 0x149   :  { %v396_v23 = vadd.f32 %v394_v19, %v392_v21  ;;  %v397_v24 = vadd.f32 %v395_v20, %v393_v22  ;;  %v1533_v18 = vld [vmem:[#allocation7 + $0x94] ss:$12 sps:$4 sm:$0xff]   ;;  %v1531_v19 = vld [vmem:[#allocation7 + $0x90] ss:$12 sps:$4 sm:$0xff]   ;;  %v1534_v20 = vld [vmem:[#allocation7 + $0x98] ss:$12 sps:$4 sm:$0xff]  }
 0x14a   :  { %v1537_v21 = vld [vmem:[#allocation7 + $0xac] ss:$12 sps:$4 sm:$0xff]   ;;  %v1535_v22 = vld [vmem:[#allocation7 + $0xa8] ss:$12 sps:$4 sm:$0xff]  }
 0x14b   :  { %v400_v27 = vadd.f32 %v397_v24, %v396_v23 }
 0x14d   :  { %v401_v28 = vrot.slane %v400_v27, 4 }
 0x14f   :  { %v402_v29 = vadd.f32 %v401_v28, %v400_v27 }
 0x151   :  { %v403_v30 = vrot.slane %v402_v29, 2 }
 0x153   :  { %v404_v33 = vadd.f32 %v403_v30, %v402_v29  ;;  %v398_v29 = vld [vmem:[%s2006_s4] sm:$0x1] }
 0x155   :  { %v405_v34 = vrot.slane %v404_v33, 1 }
 0x157   :  { %v406_v36 = vadd.f32 %v405_v34, %v404_v33 }
 0x159   :  { %1239 = vmatmul.mubr.f32.vlgmr.msra.gmra.mrb[4].mxu0 %v406_v36  ;;  %v1074_v36 = vld [vmem:[%s2007_s5] ss:$0 sm:$0xff] }
 0x15a   :  { %775 = vmatprep.mubr.bf16.mxu0 %v1670_v1  ;;  %744 = vmatpush1.bf16.msra.mxu0 %v1507_v37 }
 0x15b   :  { %745 = vmatprep.subr.bf16.mxu0 %v1513_v40 }
 0x15e   :  { %746 = vmatpush1.bf16.msra.mxu0 %v1511_v42 }
 0x15f   :  { %747 = vmatprep.subr.bf16.mxu0 %v1517_v2 }
 0x162   :  { %748 = vmatpush1.bf16.msra.mxu0 %v1515_v3 }
 0x163   :  { %749 = vmatprep.subr.bf16.mxu0 %v1521_v6 }
 0x166   :  { %750 = vmatpush1.bf16.msra.mxu0 %v1519_v7 }
 0x167   :  { %751 = vmatprep.subr.bf16.mxu0 %v1525_v10 }
 0x16a   :  { %752 = vmatpush1.bf16.msra.mxu0 %v1523_v13 }
 0x16b   :  { %753 = vmatprep.subr.bf16.mxu0 %v1529_v15 }
 0x16e   :  { %754 = vmatpush1.bf16.msra.mxu0 %v1527_v16 }
 0x16f   :  { %755 = vmatprep.subr.bf16.mxu0 %v1533_v18 }
 0x172   :  { %756 = vmatpush1.bf16.msra.mxu0 %v1531_v19 }
 0x173   :  { %757 = vmatprep.subr.bf16.mxu0 %v1537_v21 }
 0x176   :  { %758 = vmatpush1.bf16.msra.mxu0 %v1535_v22 }
 0x177   :  { %1414 = vmatprep.subr.bf16.mxu0 %v1672_v32 }
 0x22c   :  { %v473_v45 = vpop.f32.mrb[4].mxu0 }
 0x22d   :  { %v480_v46 = vrot.slane %v473_v45, %v1896_v43  ;;  %v1240_v48 = vpop.f32.mrb[5].mxu0 }
 0x22f   :  { %v1899_v49 = vsub.f32 %v396_v23, %v480_v46  ;;  %v1901_v51 = vsub.f32 %v397_v24, %v480_v46  ;;  %v1538_v23 = vld [vmem:[#allocation7 + $0xb0] ss:$12 sps:$4 sm:$0xff]  }
 0x231   :  { %v483_v1 = vmul.f32 %v1899_v49, %v1899_v49  ;;  %v484_v52 = vmul.f32 %v1901_v51, %v1901_v51 }
 0x233   :  { %v485_v54 = vadd.f32 %v484_v52, %v483_v1 }
 0x235   :  { %v486_v56 = vrot.slane %v485_v54, 4 }
 0x237   :  { %v487_v57 = vadd.f32 %v486_v56, %v485_v54 }
 0x239   :  { %v488_v58 = vrot.slane %v487_v57, 2 }
 0x23b   :  { %v489_v59 = vadd.f32 %v488_v58, %v487_v57 }
 0x23d   :  { %v490_v60 = vrot.slane %v489_v59, 1 }
 0x23f   :  { %v491_v62 = vadd.f32 %v490_v60, %v489_v59 }
 0x241   :  { %1274 = vmatmul.mubr.f32.vlgmr.msra.gmra.mrb[4].mxu1 %v491_v62 }
 0x242   :  { %1277 = vmatpush3.bf16.msra.mxu1 %v1510_v61  ;;  %1292 = vmatprep.mubr.msk.bf16.mxu1 %vm1671_vm0, %v1669_v0 }
 0x243   :  { %1278 = vmatprep.subr.bf16.mxu1 %v1669_v0 }
 0x246   :  { %1279 = vmatpush3.bf16.msra.mxu1 %v1514_v63 }
 0x247   :  { %1280 = vmatprep.subr.bf16.mxu1 %v1669_v0 }
 0x24a   :  { %1281 = vmatpush3.bf16.msra.mxu1 %v1518_v5 }
 0x24b   :  { %1282 = vmatprep.subr.bf16.mxu1 %v1669_v0 }
 0x24e   :  { %1283 = vmatpush3.bf16.msra.mxu1 %v1522_v9 }
 0x24f   :  { %1284 = vmatprep.subr.bf16.mxu1 %v1669_v0 }
 0x252   :  { %1285 = vmatpush3.bf16.msra.mxu1 %v1526_v14 }
 0x253   :  { %1286 = vmatprep.subr.bf16.mxu1 %v1669_v0 }
 0x256   :  { %1287 = vmatpush3.bf16.msra.mxu1 %v1530_v17 }
 0x257   :  { %1288 = vmatprep.subr.bf16.mxu1 %v1669_v0 }
 0x25a   :  { %1289 = vmatpush3.bf16.msra.mxu1 %v1534_v20 }
 0x25b   :  { %1290 = vmatprep.subr.bf16.mxu1 %v1669_v0 }
 0x25e   :  { %1291 = vmatpush3.bf16.msra.mxu1 %v1538_v23 }
 0x25f   :  { %1438 = vmatprep.subr.bf16.mxu1 %v1672_v32 }
 0x314   :  { %v558_v24 = vpop.f32.mrb[4].mxu1 }
 0x315   :  { %v559_v27 = vadd.f32 1e-05, %v558_v24  ;;  %v1275_v28 = vpop.f32.mrb[5].mxu1 }
 0x316   :  { %v843_v28 = vld [vmem:[%s2008_s6] sm:$0x1]  ;;  %s1631_s6 = scalar_lea.vmem %s1037_s19, 256 }
 0x317   :  { %1539 = vrsqrt.f32 %v559_v27  ;;  %p1632_p4 = scmp.ne.s32.totalorder %s1037_s19, %s1631_s6  ;;  %p1637_p6 = scmp.lt.s32.totalorder %s1631_s6, %s1631_s6 }
 0x319   :  { %p1638_p7 = por %p1637_p6, %p1636_p5 }
 0x31b   :  { %p1639_p8 = pnand %p1638_p7, %p1632_p4 }
 0x321   :  { %v1540_v30 = vpop.eup %1539 }
 0x322   :  { %v563_v33 = vmul.f32 %v1540_v30, %v398_v29 }
 0x324   :  { %v568_v34 = vrot.slane %v563_v33, %v1896_v43 }
 0x326   :  { %v570_v37 = vmul.f32 %v568_v34, %v1899_v49  ;;  %v571_v39 = vmul.f32 %v568_v34, %v1901_v51  ;;  %v1099_v34 = vld [vmem:[%s2009_s7] ss:$0 sm:$0xff] }
 0x328   :  { %v578_v40 = vadd.f32 %v1074_v36, %v570_v37  ;;  %v579_v42 = vadd.f32 %v1074_v36, %v571_v39 }
 0x32a   :  { %v580_v45 = vmax.f32 %v578_v40, 0.0  ;;  %v581_v46 = vmax.f32 %v579_v42, 0.0 }
 0x32c   :  { %v582_v48 = vpack.c.bf16 %v581_v46, %v580_v45 }
 0x32e   :  { %776 = vmatmul.mubr.bf16.vlgmr.msra.gmra.mrb[8].mxu0 %v582_v48  ;;  %1293 = vmatmul.mubr.bf16.vlgmr.msra.gmra.mrb[8].mxu1 %v582_v48 }
 0x32f   :  { %1416 = vmatpush3.bf16.msra.mxu0 %v1803_v31  ;;  %1328 = vmatprep.mubr.msk.f32.mxu0 %vm1671_vm0, %v1669_v0 }
 0x330   :  { %1417 = vmatprep.subr.bf16.mxu0 %v1672_v32  ;;  %1440 = vmatpush3.bf16.msra.mxu1 %v1803_v31 }
 0x331   :  { %1441 = vmatprep.subr.bf16.mxu1 %v1672_v32  ;;  %1363 = vmatprep.mubr.msk.f32.mxu1 %vm1671_vm0, %v1669_v0 }
 0x333   :  { %1419 = vmatpush3.bf16.msra.mxu0 %v1808_v35 }
 0x334   :  { %1420 = vmatprep.subr.bf16.mxu0 %v1672_v32  ;;  %1443 = vmatpush3.bf16.msra.mxu1 %v1808_v35 }
 0x335   :  { %1444 = vmatprep.subr.bf16.mxu1 %v1672_v32 }
 0x337   :  { %1422 = vmatpush3.bf16.msra.mxu0 %v1821_v38 }
 0x338   :  { %1423 = vmatprep.subr.bf16.mxu0 %v1672_v32  ;;  %1446 = vmatpush3.bf16.msra.mxu1 %v1821_v38 }
 0x339   :  { %1447 = vmatprep.subr.bf16.mxu1 %v1672_v32 }
 0x33b   :  { %1425 = vmatpush3.bf16.msra.mxu0 %v1827_v41 }
 0x33c   :  { %1426 = vmatprep.subr.bf16.mxu0 %v1672_v32  ;;  %1449 = vmatpush3.bf16.msra.mxu1 %v1827_v41 }
 0x33d   :  { %1450 = vmatprep.subr.bf16.mxu1 %v1672_v32 }
 0x33f   :  { %1428 = vmatpush3.bf16.msra.mxu0 %v1833_v44 }
 0x340   :  { %1429 = vmatprep.subr.bf16.mxu0 %v1672_v32  ;;  %1452 = vmatpush3.bf16.msra.mxu1 %v1833_v44 }
 0x341   :  { %1453 = vmatprep.subr.bf16.mxu1 %v1672_v32 }
 0x343   :  { %1431 = vmatpush3.bf16.msra.mxu0 %v1839_v47 }
 0x344   :  { %1432 = vmatprep.subr.bf16.mxu0 %v1672_v32  ;;  %1455 = vmatpush3.bf16.msra.mxu1 %v1839_v47 }
 0x345   :  { %1456 = vmatprep.subr.bf16.mxu1 %v1672_v32 }
 0x347   :  { %1434 = vmatpush3.bf16.msra.mxu0 %v1842_v50 }
 0x348   :  { %1435 = vmatprep.subr.bf16.mxu0 %v1672_v32  ;;  %1458 = vmatpush3.bf16.msra.mxu1 %v1842_v50 }
 0x349   :  { %1459 = vmatprep.subr.bf16.mxu1 %v1672_v32 }
 0x34b   :  { %1437 = vmatpush3.bf16.msra.mxu0 %v1848_v53 }
 0x34c   :  { %1461 = vmatpush3.bf16.msra.mxu1 %v1848_v53 }
 0x401   :  { %v777_v0 = vpop.f32.mrb[8].mxu0  ;;  %v820_v31 = vpop.f32.mrb[8].mxu1 }
 0x402   :  { %v779_v35 = vpop.f32.mrb[9].mxu0  ;;  %v1294_v38 = vpop.f32.mrb[9].mxu1  ;;  %v833_v47 = vrot.slane %v820_v31, 1 }
 0x403   :  { %v781_v41 = vpop.f32.mrb[10].mxu0  ;;  %v823_v44 = vpop.f32.mrb[10].mxu1  ;;  %v827_v52 = vrot.slane %v779_v35, 7 }
 0x404   :  { %v834_v49 = vrot.slane %v823_v44, 1  ;;  %v783_v51 = vpop.f32.mrb[11].mxu0  ;;  %v1295_v1 = vpop.f32.mrb[11].mxu1 }
 0x405   :  { %v828_v54 = vrot.slane %v783_v51, 7 }
 0x406   :  { %v835_v50 = vsel %vm389_vm1, %v833_v47, %v834_v49  ;;  %v836_v32 = vsel %vm389_vm1, %v834_v49, %v833_v47 }
 0x407   :  { %v829_v53 = vsel %vm382_vm3, %v827_v52, %v828_v54  ;;  %v830_v56 = vsel %vm382_vm3, %v828_v54, %v827_v52  ;;  %v837_v61 = vsel %vm1870_vm5, %v835_v50, 0.0  ;;  %v838_v62 = vsel %vm1874_vm6, %v836_v32, 0.0 }
 0x408   :  { %v831_v57 = vsel %vm1861_vm2, %v830_v56, 0.0  ;;  %v832_v58 = vsel %vm1866_vm4, %v829_v53, 0.0 }
 0x409   :  { %v839_v59 = vadd.f32 %v831_v57, %v777_v0  ;;  %v840_v60 = vadd.f32 %v832_v58, %v781_v41 }
 0x40b   :  { %v841_v63 = vadd.f32 %v839_v59, %v837_v61  ;;  %v842_v2 = vadd.f32 %v840_v60, %v838_v62 }
 0x40d   :  { %v845_v3 = vadd.f32 %v842_v2, %v841_v63 }
 0x40f   :  { %v846_v5 = vrot.slane %v845_v3, 4 }
 0x411   :  { %v847_v55 = vadd.f32 %v846_v5, %v845_v3 }
 0x413   :  { %v848_v6 = vrot.slane %v847_v55, 2 }
 0x415   :  { %v849_v7 = vadd.f32 %v848_v6, %v847_v55 }
 0x417   :  { %v850_v4 = vrot.slane %v849_v7, 1 }
 0x419   :  { %v851_v9 = vadd.f32 %v850_v4, %v849_v7 }
 0x41b   :  { %1329 = vmatmul.mubr.f32.vlgmr.msra.gmra.mrb[6].mxu0 %v851_v9 }
 0x4ee   :  { %v918_v8 = vpop.f32.mrb[6].mxu0 }
 0x4ef   :  { %v925_v10 = vrot.slane %v918_v8, %v1896_v43  ;;  %v1330_v13 = vpop.f32.mrb[7].mxu0 }
 0x4f1   :  { %v926_v14 = vsub.f32 %v841_v63, %v925_v10  ;;  %v927_v11 = vsub.f32 %v842_v2, %v925_v10 }
 0x4f3   :  { %v928_v15 = vmul.f32 %v926_v14, %v926_v14  ;;  %v929_v16 = vmul.f32 %v927_v11, %v927_v11 }
 0x4f5   :  { %v930_v12 = vadd.f32 %v929_v16, %v928_v15 }
 0x4f7   :  { %v931_v17 = vrot.slane %v930_v12, 4 }
 0x4f9   :  { %v932_v18 = vadd.f32 %v931_v17, %v930_v12 }
 0x4fb   :  { %v933_v19 = vrot.slane %v932_v18, 2 }
 0x4fd   :  { %v934_v20 = vadd.f32 %v933_v19, %v932_v18 }
 0x4ff   :  { %v935_v21 = vrot.slane %v934_v20, 1 }
 0x501   :  { %v936_v22 = vadd.f32 %v935_v21, %v934_v20 }
 0x503   :  { %1364 = vmatmul.mubr.f32.vlgmr.msra.gmra.mrb[6].mxu1 %v936_v22 }
 0x5d6   :  { %v1003_v23 = vpop.f32.mrb[6].mxu1 }
 0x5d7   :  { %v1004_v24 = vadd.f32 1e-05, %v1003_v23  ;;  %v1365_v27 = vpop.f32.mrb[7].mxu1 }
 0x5d9   :  { %1541 = vrsqrt.f32 %v1004_v24 }
 0x5e3   :  { %v1542_v29 = vpop.eup %1541 }
 0x5e4   :  { %v1008_v30 = vmul.f32 %v1542_v29, %v843_v28 }
 0x5e6   :  { %v1013_v33 = vrot.slane %v1008_v30, %v1896_v43 }
 0x5e8   :  { %v1015_v36 = vmul.f32 %v1013_v33, %v926_v14  ;;  %v1016_v37 = vmul.f32 %v1013_v33, %v927_v11 }
 0x5ea   :  { %v1023_v39 = vadd.f32 %v1099_v34, %v1015_v36  ;;  %v1024_v40 = vadd.f32 %v1099_v34, %v1016_v37 }
 0x5ec   :  { %v1025_v42 = vadd.f32 %v1023_v39, %v1796_v25  ;;  %v1026_v45 = vadd.f32 %v1024_v40, %v1798_v26 }
 0x5ee   :  { %v1027_v46 = vmax.f32 %v1025_v42, 0.0  ;;  %v1028_v48 = vmax.f32 %v1026_v45, 0.0 }
 0x5f0   :  { %1029 = vst [vmem:[#allocation10] sm:$0xff] %v1027_v46  ;;  %1030 = vst [vmem:[#allocation10 + $0x8] sm:$0xff] %v1028_v48 }
 0x5f1   :  { %1642 = shalt.err (!%p1639_p8)
}
 0x5f2   :  { %s1643_s22 = scalar_lea.hbm %s2010_s8, 256 }
 0x5f3   :  { %p1644_p9 = scmp.ne.s32.totalorder %s2010_s8, %s1643_s22  ;;  %p1647_p10 = scmp.lt.u32.totalorder %s1643_s22, %s2010_s8 }
 0x5f5   :  { %p1649_p11 = pnand %p1647_p10, %p1644_p9 }
 0x5f7   :  { %1652 = shalt.err (!%p1649_p11)
}
 0x5f8   :  { %1042 = dma.vmem_to_hbm [thread:$0]  %s1037_s19, 256, %s2010_s8, [#allocation4], %s1665_s1, %s1665_s1, %s1666_s28  }
 0x5f9   :  { %1659 = dma.done.wait [#allocation4], 256  }
 0x5fa   :  { %1660 = vsyncadd [#allocation4], 4294967040 }
 0x5fb   :  { %1046 = vsyncpa [#allocation3], 1 }
 0x5fc   :  { %1047 = vsyncpa [#allocation6], 1 }
 0x5fd   :  { %1048 = vsyncpa [#allocation9], 1 }
 0x5fe   :  { %1049 = vsyncpa [#allocation4], 1 }

</bundles_post_ra>
